<compile_context>
chip_gen: v6e
topology: v6e:2x2x1
jax: 0.10.0
libtpu: 0.0.40
codegen_flags: <defaults>
</compile_context>

<pallas_src>
import jax
import jax.numpy as jnp
from jax import lax
from jax.experimental import pallas as pl
from jax.experimental.pallas import tpu as pltpu

_LANES = 128
_VMEM_WORKING_SET_BUDGET = 48 * 1024 * 1024   # headroom under v7x's 64 MiB
_VMEM_LIMIT_FLOOR = 32 * 1024 * 1024
_VMEM_LIMIT_CAP = 56 * 1024 * 1024


def _mlp_kernel(x_ref, w_ref, b_ref, o_ref):
    # x_ref: (C, tn)  -- channels on sublanes, tokens lane-dense
    # w_ref: (C, E)   -- transposed nn.Linear weight
    # b_ref: (1, E)   -- f32 bias row
    # o_ref: (tn, E)
    acc = lax.dot_general(
        x_ref[...], w_ref[...],
        dimension_numbers=(((0,), (0,)), ((), ())),   # contract channel axis
        preferred_element_type=jnp.float32,
    )                                                 # (tn, E), f32 accumulate
    o_ref[...] = (acc + b_ref[...]).astype(o_ref.dtype)


def prepare_mlp_params(weight, bias, *, compute_dtype=None):
    """One-time parameter prep; hoist out of the per-step path.

    weight (E, C) -> transposed (C, E) (optionally cast to compute_dtype);
    bias (E,) -> (1, E) f32 row (always added to the f32 accumulator).
    """
    wt = jnp.asarray(weight).T
    if compute_dtype is not None:
        wt = wt.astype(compute_dtype)
    b_row = jnp.asarray(bias, dtype=jnp.float32).reshape(1, -1)
    return wt, b_row


def _select_tn(N, B, C, E, in_itemsize, out_itemsize, tn_req):
    """Token-tile size (lane axis of the activation block)."""
    if tn_req is None:
        tn = 4096 if in_itemsize <= 2 else 2048
    else:
        tn = int(tn_req)
    tn = max(_LANES, (tn // _LANES) * _LANES)

    # VMEM budget: double-buffered activation + output tiles, plus params
    # (counted double-buffered here as the worst case).
    param_bytes = 2 * (C * E * in_itemsize + E * 4)
    per_token = 2 * C * in_itemsize + 2 * E * out_itemsize
    tn_budget = (_VMEM_WORKING_SET_BUDGET - param_bytes) // max(per_token, 1)
    tn_budget = max(_LANES, (tn_budget // _LANES) * _LANES)
    tn = min(tn, tn_budget)

    if N <= tn:
        tn = N  # full-dim block: always legal
        # Keep both v7x TensorCores busy: avoid a degenerate 1-step grid.
        if B == 1 and N >= 2 * _LANES:
            tn = max(_LANES, ((N // 2) // _LANES) * _LANES)
    else:
        # Prefer a tile that divides N exactly (no masked partial last tile),
        # staying within 2x of the requested size.
        for cand in range(tn, max(_LANES, tn // 2) - 1, -_LANES):
            if N % cand == 0:
                tn = cand
                break
    return tn


def _pallas_apply(x3d, wt, b_row, *, tn, out_dtype, single_buffer_params):
    B, C, N = x3d.shape
    E = wt.shape[1]
    n_tiles = pl.cdiv(N, tn)

    in_itemsize = jnp.dtype(x3d.dtype).itemsize
    w_itemsize = jnp.dtype(wt.dtype).itemsize
    out_itemsize = jnp.dtype(out_dtype).itemsize

    # Honest VMEM accounting (at production shapes this is ~20-25 MiB, not
    # "<1 MiB"): double-buffered x & out tiles + resident params.
    n_param_bufs = 1 if single_buffer_params else 2
    working_set = (2 * C * tn * in_itemsize
                   + 2 * tn * E * out_itemsize
                   + n_param_bufs * (C * E * w_itemsize + E * 4))
    vmem_limit = int(min(_VMEM_LIMIT_CAP,
                         max(_VMEM_LIMIT_FLOOR, int(1.5 * working_set))))

    cost = pl.CostEstimate(
        flops=2 * B * N * C * E,
        transcendentals=0,
        bytes_accessed=(B * N * C * in_itemsize
                        + C * E * w_itemsize + E * 4
                        + B * N * E * out_itemsize),
    )

    param_mode = {}
    if single_buffer_params:
        # Constant index_map => never re-DMA'd; one buffer suffices and the
        # saved VMEM converts directly into larger token tiles.
        param_mode = dict(pipeline_mode=pl.Buffered(1))

    return pl.pallas_call(
        _mlp_kernel,
        out_shape=jax.ShapeDtypeStruct((B, N, E), out_dtype),
        grid=(B, n_tiles),
        in_specs=[
            # (C, tn) activation tile, read straight out of the NCHW layout.
            pl.BlockSpec((None, C, tn), lambda b, j: (b, 0, j)),
            # Full (C, E) transposed weight, resident across the grid.
            pl.BlockSpec((C, E), lambda b, j: (0, 0), **param_mode),
            # Bias row (f32, added to the f32 accumulator).
            pl.BlockSpec((1, E), lambda b, j: (0, 0), **param_mode),
        ],
        out_specs=pl.BlockSpec((None, tn, E), lambda b, j: (b, j, 0)),
        compiler_params=pltpu.CompilerParams(
            dimension_semantics=("parallel", "parallel"),
            vmem_limit_bytes=vmem_limit,
        ),
        cost_estimate=cost,
    )(x3d, wt, b_row)


def mlp_forward_prepared(x_nchw, wt, b_row, *, tn=None, out_dtype=None):
    """Forward with already-prepared params (see prepare_mlp_params)."""
    B, C, H, W = x_nchw.shape
    Cw, E = wt.shape
    assert Cw == C, f"weight expects {Cw} input channels, activation has {C}"
    N = H * W
    x3d = x_nchw.reshape(B, C, N)           # metadata-only reshape
    if out_dtype is None:
        out_dtype = x3d.dtype

    tn = _select_tn(N, B, C, E,
                    jnp.dtype(x3d.dtype).itemsize,
                    jnp.dtype(out_dtype).itemsize,
                    tn)
    try:
        return _pallas_apply(x3d, wt, b_row, tn=tn, out_dtype=out_dtype,
                             single_buffer_params=True)
    except Exception:
        # pipeline_mode=pl.Buffered(1) unsupported on this jax version:
        # fall back to default double-buffering of the invariant params.
        return _pallas_apply(x3d, wt, b_row, tn=tn, out_dtype=out_dtype,
                             single_buffer_params=False)


def mlp_forward(x_nchw, weight, bias, *, tn=None, compute_dtype=None,
                out_dtype=None):
    """Pallas MLP.forward: x.flatten(2).transpose(1, 2) @ weight.T + bias.

    x_nchw : (B, C, H, W)
    weight : (E, C)  nn.Linear weight (PyTorch convention)
    bias   : (E,)
    compute_dtype : jnp.bfloat16 is the recommended production setting
        (halves activation-read and, by default, output-write HBM traffic;
        MXU accumulation stays f32).  None keeps the input dtype (faithful
        to the PyTorch module's numerics).
    out_dtype : defaults to the (possibly cast) activation dtype; pass
        jnp.float32 to keep f32 outputs with bf16 compute.
    returns: (B, H*W, E)
    """
    if compute_dtype is not None:
        x_nchw = x_nchw.astype(compute_dtype)
    wt, b_row = prepare_mlp_params(weight, bias, compute_dtype=compute_dtype)
    return mlp_forward_prepared(x_nchw, wt, b_row, tn=tn, out_dtype=out_dtype)


if __name__ == "__main__":
    # Small shapes consistent with the module: input_dim=C, embed_dim=E.
    B, C, H, W = 2, 16, 16, 16
    E = 32

    key = jax.random.PRNGKey(0)
    kx, kw, kb = jax.random.split(key, 3)
    x = jax.random.normal(kx, (B, C, H, W), dtype=jnp.float32)
    bound = 1.0 / (C ** 0.5)                 # nn.Linear default init range
    weight = jax.random.uniform(kw, (E, C), minval=-bound, maxval=bound,
                                dtype=jnp.float32)
    bias = jax.random.uniform(kb, (E,), minval=-bound, maxval=bound,
                              dtype=jnp.float32)

    # Plain-JAX reference (same math as the PyTorch forward).
    ref = jnp.transpose(x.reshape(B, C, H * W), (0, 2, 1)) @ weight.T + bias

    # 1) Semantics-faithful f32 path.
    out = jax.block_until_ready(mlp_forward(x, weight, bias))
    assert out.shape == (B, H * W, E) and out.dtype == jnp.float32
    # Tolerance covers possible MXU pass-count differences vs the XLA
    # reference for f32 matmuls; structural bugs would be O(1) off.
    assert jnp.allclose(out, ref, atol=5e-2, rtol=5e-2), \
        float(jnp.max(jnp.abs(out - ref)))

    # 2) Recommended production path: bf16 I/O, f32 accumulation.
    out_bf16 = jax.block_until_ready(
        mlp_forward(x, weight, bias, compute_dtype=jnp.bfloat16))
    assert out_bf16.shape == (B, H * W, E) and out_bf16.dtype == jnp.bfloat16
    assert jnp.allclose(out_bf16.astype(jnp.float32), ref,
                        atol=5e-2, rtol=5e-2), \
        float(jnp.max(jnp.abs(out_bf16.astype(jnp.float32) - ref)))

    print("KERNEL_OK")
</pallas_src>

<mosaic_0001>
module attributes {stable_mosaic.version = 11 : i64} {
  func.func @_mlp_kernel(%arg0: i32, %arg1: i32, %arg2: memref<1x16x256xf32, #tpu.memory_space<vmem>>, %arg3: memref<16x32xf32, #tpu.memory_space<vmem>>, %arg4: memref<1x32xf32, #tpu.memory_space<vmem>>, %arg5: memref<1x256x32xf32, #tpu.memory_space<vmem>>) attributes {dimension_semantics = [#tpu.dimension_semantics<parallel>, #tpu.dimension_semantics<parallel>], iteration_bounds = array<i64: 2, 1>, scalar_prefetch = 0 : i64, scratch_operands = 0 : i64, tpu.core_type = #tpu.core_type<tc>, window_params = [{transform_indices = @transform_0, window_bounds = array<i64: 1, 16, 256>}, {pipeline_mode = #tpu.pipeline_mode<synchronous>, transform_indices = @transform_1, window_bounds = array<i64: 16, 32>}, {pipeline_mode = #tpu.pipeline_mode<synchronous>, transform_indices = @transform_2, window_bounds = array<i64: 1, 32>}, {transform_indices = @transform_3, window_bounds = array<i64: 1, 256, 32>}]} {
    %c0 = arith.constant 0 : index
    %c0_0 = arith.constant 0 : index
    %c0_1 = arith.constant 0 : index
    %0 = vector.load %arg2[%c0, %c0_0, %c0_1] : memref<1x16x256xf32, #tpu.memory_space<vmem>>, vector<1x16x256xf32>
    %1 = vector.shape_cast %0 : vector<1x16x256xf32> to vector<16x256xf32>
    %c0_2 = arith.constant 0 : index
    %c0_3 = arith.constant 0 : index
    %2 = vector.load %arg3[%c0_2, %c0_3] : memref<16x32xf32, #tpu.memory_space<vmem>>, vector<16x32xf32>
    %cst = arith.constant dense<0.000000e+00> : vector<256x32xf32>
    %3 = tpu.matmul %1, %2, %cst {dimension_numbers = #tpu.dot_dimension_numbers<[0], [0], [1], [1], [0, 1, 1, 1], [], []>} : vector<16x256xf32>, vector<16x32xf32>, vector<256x32xf32> -> vector<256x32xf32>
    %c0_4 = arith.constant 0 : index
    %c0_5 = arith.constant 0 : index
    %4 = vector.load %arg4[%c0_4, %c0_5] : memref<1x32xf32, #tpu.memory_space<vmem>>, vector<1x32xf32>
    %5 = vector.broadcast %4 : vector<1x32xf32> to vector<256x32xf32>
    %6 = arith.addf %3, %5 : vector<256x32xf32>
    %c0_6 = arith.constant 0 : index
    %c0_7 = arith.constant 0 : index
    %c0_8 = arith.constant 0 : index
    %7 = vector.load %arg5[%c0_6, %c0_7, %c0_8] : memref<1x256x32xf32, #tpu.memory_space<vmem>>, vector<1x256x32xf32>
    %8 = vector.shape_cast %7 : vector<1x256x32xf32> to vector<256x32xf32>
    %9 = vector.shape_cast %6 : vector<256x32xf32> to vector<1x256x32xf32>
    tpu.vector_store %arg5[%c0_6, %c0_7, %c0_8], %9 {strides = array<i32>} : memref<1x256x32xf32, #tpu.memory_space<vmem>>, vector<1x256x32xf32>,
    return
  }
  func.func @transform_0(%arg0: i32, %arg1: i32) -> (i32, i32, i32) {
    %c0_i32 = arith.constant 0 : i32
    %c0_i32_0 = arith.constant 0 : i32
    return %arg0, %c0_i32, %arg1 : i32, i32, i32
  }
  func.func @transform_1(%arg0: i32, %arg1: i32) -> (i32, i32) {
    %c0_i32 = arith.constant 0 : i32
    %c0_i32_0 = arith.constant 0 : i32
    %c0_i32_1 = arith.constant 0 : i32
    return %c0_i32, %c0_i32_0 : i32, i32
  }
  func.func @transform_2(%arg0: i32, %arg1: i32) -> (i32, i32) {
    %c0_i32 = arith.constant 0 : i32
    %c0_i32_0 = arith.constant 0 : i32
    %c0_i32_1 = arith.constant 0 : i32
    return %c0_i32, %c0_i32_0 : i32, i32
  }
  func.func @transform_3(%arg0: i32, %arg1: i32) -> (i32, i32, i32) {
    %c0_i32 = arith.constant 0 : i32
    %c0_i32_0 = arith.constant 0 : i32
    return %arg0, %arg1, %c0_i32 : i32, i32, i32
  }
}

module attributes {stable_mosaic.version = 11 : i64} {
  func.func @_mlp_kernel(%arg0: i32, %arg1: i32, %arg2: memref<1x16x256xf32, #tpu.memory_space<vmem>>, %arg3: memref<16x32xf32, #tpu.memory_space<vmem>>, %arg4: memref<1x32xf32, #tpu.memory_space<vmem>>, %arg5: memref<1x256x32xf32, #tpu.memory_space<vmem>>) attributes {dimension_semantics = [#tpu.dimension_semantics<parallel>, #tpu.dimension_semantics<parallel>], iteration_bounds = array<i64: 2, 1>, scalar_prefetch = 0 : i64, scratch_operands = 0 : i64, tpu.core_type = #tpu.core_type<tc>, window_params = [{transform_indices = @transform_0, window_bounds = array<i64: 1, 16, 256>}, {pipeline_mode = #tpu.pipeline_mode<synchronous>, transform_indices = @transform_1, window_bounds = array<i64: 16, 32>}, {pipeline_mode = #tpu.pipeline_mode<synchronous>, transform_indices = @transform_2, window_bounds = array<i64: 1, 32>}, {transform_indices = @transform_3, window_bounds = array<i64: 1, 256, 32>}]} {
    %c0 = arith.constant 0 : index
    %c0_0 = arith.constant 0 : index
    %c0_1 = arith.constant 0 : index
    %0 = vector.load %arg2[%c0, %c0_0, %c0_1] : memref<1x16x256xf32, #tpu.memory_space<vmem>>, vector<1x16x256xf32>
    %1 = vector.shape_cast %0 : vector<1x16x256xf32> to vector<16x256xf32>
    %c0_2 = arith.constant 0 : index
    %c0_3 = arith.constant 0 : index
    %2 = vector.load %arg3[%c0_2, %c0_3] : memref<16x32xf32, #tpu.memory_space<vmem>>, vector<16x32xf32>
    %cst = arith.constant dense<0.000000e+00> : vector<256x32xf32>
    %3 = tpu.matmul %1, %2, %cst {dimension_numbers = #tpu.dot_dimension_numbers<[0], [0], [1], [1], [0, 1, 1, 1], [], []>} : vector<16x256xf32>, vector<16x32xf32>, vector<256x32xf32> -> vector<256x32xf32>
    %c0_4 = arith.constant 0 : index
    %c0_5 = arith.constant 0 : index
    %4 = vector.load %arg4[%c0_4, %c0_5] : memref<1x32xf32, #tpu.memory_space<vmem>>, vector<1x32xf32>
    %5 = vector.broadcast %4 : vector<1x32xf32> to vector<256x32xf32>
    %6 = arith.addf %3, %5 : vector<256x32xf32>
    %c0_6 = arith.constant 0 : index
    %c0_7 = arith.constant 0 : index
    %c0_8 = arith.constant 0 : index
    %7 = vector.load %arg5[%c0_6, %c0_7, %c0_8] : memref<1x256x32xf32, #tpu.memory_space<vmem>>, vector<1x256x32xf32>
    %8 = vector.shape_cast %7 : vector<1x256x32xf32> to vector<256x32xf32>
    %9 = vector.shape_cast %6 : vector<256x32xf32> to vector<1x256x32xf32>
    tpu.vector_store %arg5[%c0_6, %c0_7, %c0_8], %9 {strides = array<i32>} : memref<1x256x32xf32, #tpu.memory_space<vmem>>, vector<1x256x32xf32>,
    return
  }
  func.func @transform_0(%arg0: i32, %arg1: i32) -> (i32, i32, i32) {
    %c0_i32 = arith.constant 0 : i32
    %c0_i32_0 = arith.constant 0 : i32
    return %arg0, %c0_i32, %arg1 : i32, i32, i32
  }
  func.func @transform_1(%arg0: i32, %arg1: i32) -> (i32, i32) {
    %c0_i32 = arith.constant 0 : i32
    %c0_i32_0 = arith.constant 0 : i32
    %c0_i32_1 = arith.constant 0 : i32
    return %c0_i32, %c0_i32_0 : i32, i32
  }
  func.func @transform_2(%arg0: i32, %arg1: i32) -> (i32, i32) {
    %c0_i32 = arith.constant 0 : i32
    %c0_i32_0 = arith.constant 0 : i32
    %c0_i32_1 = arith.constant 0 : i32
    return %c0_i32, %c0_i32_0 : i32, i32
  }
  func.func @transform_3(%arg0: i32, %arg1: i32) -> (i32, i32, i32) {
    %c0_i32 = arith.constant 0 : i32
    %c0_i32_0 = arith.constant 0 : i32
    return %arg0, %arg1, %c0_i32 : i32, i32, i32
  }
}

</mosaic_0001>

<bundles_post_ra>
// kernel: tpu_custom_call.1
= control target key start
LH: loop header
LB: loop body
LE: loop exit
PB: predicated region body
PF: predicated region fallthrough
CT: control target
= control target key end

     0   :  { %8 = vsyncpa [#allocation3], 0  ;;  %s1374_s0 = inlined_call_operand.hbm [shape: f32[2,16,256], index: 0, kind: input, shape index: {}]   ;;  %s1375_s1 = inlined_call_operand.hbm [shape: f32[16,32], index: 1, kind: input, shape index: {}]   ;;  %s1376_s2 = inlined_call_operand.vmem [shape: f32[1,32], index: 2, kind: input, shape index: {}]   ;;  %s1377_s3 = inlined_call_operand.vmem [shape: f32[2,256,32], index: 3, kind: output, shape index: {}]  }
   0x1   :  { %10 = vsyncpa [#allocation3 + $0x1], 0 }
   0x2   :  { %11 = vsyncpa [#allocation5], 0  ;;  %s1118_s12 = smov 0   ;;  %s1120_s13 = smov 0  }
   0x3   :  { %s1122_s14 = smov 0   ;;  %s1124_s15 = smov 0  }
   0x4   :  { %s1126_s16 = smov 0   ;;  %s1128_s17 = smov 0  }
   0x5 LB: > { %s771_s18 = sadd.s32 4294967295, %s1090_s17   ;;  %p51_p0 = scmp.ne.s32.totalorder %s1074_s13, %s1070_s12  ;;  %s1090_s17 = sphi %s1128_s17, %s17_s17   ;;  %s1086_s16 = sphi %s1126_s16, %s1387_s16   ;;  %s1082_s15 = sphi %s1124_s15, %s1386_s15   ;;  %s1078_s14 = sphi %s1122_s14, %s1385_s14   ;;  %s1074_s13 = sphi %s1120_s13, %s1384_s13   ;;  %s1070_s12 = sphi %s1118_s12, %s1383_s12  }
   0x6   : > { %p1148_p1 = scmp.eq.s32.totalorder %s771_s18, 0  ;;  %p773_p2 = scmp.ge.s32.totalorder %s1090_s17, 1 }
   0x7   : > { %p132_p3 = scmp.lt.s32.totalorder %s1090_s17, 3  ;;  %s1092_s22 = smov [#allocation4]  }
   0x8   : > { %p1156_p4 = por %p1148_p1, %p51_p0  ;;  %s144_s23 = sshll.u32 %s1092_s22, 4  ;;  %s145_s23 = int_to_ptr.vmem [resolvable:$true] %s144_s23 }
   0x9   : > { %p1160_p5 = pnand %p773_p2, %p132_p3  ;;  %s29_s25 = sadd.s32 1, %s1086_s16 }
   0xa   : > { %s993_s26 = scalar_lea.vmem %s145_s23, 256  ;;  %p1001_p12 = scmp.lt.s32.totalorder %s145_s23, %s145_s23 }
   0xb   : > { %p917_p6 = pneg %p1160_p5  ;;  %p994_p9 = scmp.ne.s32.totalorder %s145_s23, %s993_s26 }
   0xc   : > { %p1002_p13 = scmp.lt.s32.totalorder %s993_s26, %s993_s26 }
   0xd   : > { %p1168_p7 = pnand %p917_p6, %p1148_p1 }
   0xe   : > { %p1003_p0 = por %p1002_p13, %p1001_p12 }
   0xf   : > { %p984_p8 = pneg %p1168_p7 }
  0x11   : > { %p996_p10 = pnand %p994_p9, %p984_p8 }
  0x13   : > { %p997_p11 = pneg %p996_p10 }
  0x15   : > { %p1004_p2 = pnand %p1003_p0, %p997_p11 }
  0x17   : > { %1007 = shalt.err (!%p1004_p2)
}
  0x18   : > { %s1093_s27 = smov 128   ;;  %s1094_s28 = smov 8  }
  0x19   : > { %920 = dma.hbm_to_vmem [thread:$0]  (!%p1168_p7), %s1375_s1, 256, %s145_s23, [#allocation5], %s1093_s27, %s1093_s27, %s1094_s28  }
  0x1a   : > { %p31_p3 = scmp.ge.s32.totalorder %s29_s25, 2  ;;  %s38_s4 = sadd.s32 1, %s1078_s14 }
  0x1b   : > { %p45_p6 = scmp.ne.s32.totalorder %s1078_s14, %s1074_s13  ;;  %p46_p8 = scmp.eq.s32.totalorder %s1090_s17, 0 }
  0x1c   : > { %s1389_s25 = smov (%p31_p3, %s29_s25), 0  ;;  %p926_p10 = scmp.lt.s32.totalorder %s1090_s17, 2 }
  0x1d   : > { %p47_p9 = por %p46_p8, %p45_p6  ;;  %s33_s5 = ssub.s32 %s1086_s16, %s1389_s25 }
  0x1e   : > { %s161_s6 = sand.u32 1, %s1078_s14   ;;  %p36_p11 = scmp.eq.s32.totalorder %s33_s5, 0 }
  0x1f   : > { %s776_s7 = sshll.u32 %s161_s6, 5  ;;  %s819_s8 = sshll.u32 %s1086_s16, 9 }
  0x20   : > { %s1192_s9 = scalar_select %p36_p11, %s1078_s14, %s38_s4  }
  0x21   : > { %s173_s12 = scalar_lea.hbm %s1374_s0, %s819_s8  ;;  %s165_s18 = scalar_lea.vmem [#allocation2], %s776_s7 }
  0x22   : > { %s174_s22 = sshll.u32 %s165_s18, 4  ;;  %p1197_p7 = pnand %p926_p10, %p47_p9  ;;  %s175_s22 = int_to_ptr.vmem [resolvable:$true] %s174_s22 }
  0x23   : > { %s162_s24 = scalar_lea.sflag [#allocation3], %s161_s6  ;;  %s1021_s26 = scalar_lea.vmem %s175_s22, 512 }
  0x24   : > { %p1010_p12 = pneg %p1197_p7  ;;  %p1022_p13 = scmp.ne.s32.totalorder %s175_s22, %s1021_s26 }
  0x25   : > { %s1095_s27 = smov [#allocation2]  }
  0x26   : > { %p1024_p0 = pnand %p1022_p13, %p1010_p12  ;;  %s1026_s28 = sshll.u32 %s1095_s27, 4  ;;  %s1027_s28 = int_to_ptr.vmem [resolvable:$false] %s1026_s28 }
  0x27   : > { %s1028_s29 = scalar_lea.vmem %s1027_s28, 1024  ;;  %p1029_p3 = scmp.lt.s32.totalorder %s175_s22, %s1027_s28 }
  0x28   : > { %p1025_p2 = pneg %p1024_p0  ;;  %p1030_p6 = scmp.lt.s32.totalorder %s1028_s29, %s1021_s26 }
  0x2a   : > { %p1031_p8 = por %p1030_p6, %p1029_p3 }
  0x2c   : > { %p1032_p9 = pnand %p1031_p8, %p1025_p2 }
  0x2e   : > { %1035 = shalt.err (!%p1032_p9)
}
  0x2f   : > { %s1096_s30 = smov 256   ;;  %s1097_s4 = smov 16  }
  0x30   : > { %924 = dma.hbm_to_vmem [thread:$0]  (!%p1197_p7), %s173_s12, 512, %s175_s22, %s162_s24, %s1096_s30, %s1096_s30, %s1097_s4  }
  0x31   : > { %186 = sbr.rel (%p1160_p5) target bundleno = 441 (0x1b9), region = 32  ;;  %s188_s5 = sand.u32 (!%p1160_p5), 1, %s1074_s13  }
  0x32   : > { %s780_s6 = sshll.u32 (!%p1160_p5), %s188_s5, 5  ;;  %s189_s7 = scalar_lea.sflag (!%p1160_p5), [#allocation3], %s188_s5 }
  0x33   : > { %s192_s8 = scalar_lea.vmem (!%p1160_p5), [#allocation2], %s780_s6 }
  0x36   : > { %1061 = dma.done.wait (%p1156_p4), %s189_s7, 512  }
  0x37   : > { %1063 = vsyncadd (%p1156_p4), %s189_s7, 4294966784 }
  0x38   : > { %1065 = dma.done.wait (%p1148_p1), [#allocation5], 256  }
  0x39   : > { %1067 = vsyncadd (%p1148_p1), [#allocation5], 4294967040  ;;  %v235_v0 = vld [vmem:[%s192_s8 + $0x8] sm:$0xff]  ;;  %v234_v1 = vld [vmem:[%s192_s8] sm:$0xff]  ;;  %vm311_vm0 = vcmask 130048   ;;  %p225_p1 = scmp.lt.s32.totalorder %s1082_s15, 1 }
  0x3a   : > { %279 = vxpose.xlu1.b32.start [1/2] (short) %v235_v0, 128  ;;  %247 = vxpose.xlu0.b32.start [1/2] (short) %v234_v1, 128  ;;  %v239_v2 = vld [vmem:[#allocation4 + $0x8] sm:$0xff]  ;;  %v238_v3 = vld [vmem:[#allocation4] sm:$0xff]  ;;  %v237_v4 = vld [vmem:[%s192_s8 + $0x18] sm:$0xff]  ;;  %vm633_vm1 = vcmask 261120  }
  0x3b   : > { %v236_v5 = vld [vmem:[%s192_s8 + $0x10] sm:$0xff]  ;;  %855 = vmatprep.subr.mxu0 %v239_v2  ;;  %907 = vmatprep.subr.mxu1 %v239_v2  ;;  %s1391_s15 = smov (!%p225_p1, %s1082_s15), 1  ;;  %v1253_v38 = vld [vmem:[%s1376_s2] ss:$0 sm:$0xff] }
  0x3c   : > { %856 = vmatpush3.msra.mxu0 %v239_v2  ;;  %909 = vmatpush3.msra.mxu1 %v239_v2  ;;  %s820_s19 = sshll.u32 %s1391_s15, 8 }
  0x3d   : > { %857 = vmatprep.subr.mxu0 %v238_v3  ;;  %908 = vmatprep.subr.mxu1 %v238_v3  ;;  %s1258_s12 = scalar_lea.vmem %s1377_s3, %s820_s19 }
  0x3e   : > { %280 = vxpose.xlu1.b32.end [2/2] (short) %v237_v4, 128  ;;  %248 = vxpose.xlu0.b32.end [2/2] (short) %v236_v5, 128 }
  0x3f   : > { %858 = vmatpush3.msra.mxu0 %v238_v3  ;;  %910 = vmatpush3.msra.mxu1 %v238_v3 }
  0xb6   : > { %v295_v6 = vpop.trf.xlu1  ;;  %v263_v7 = vpop.trf.xlu0 }
  0xb7   : > { %859 = vmatprep.mubr.msk.f32.mxu0 %vm311_vm0, %v263_v7  ;;  %883 = vmatprep.mubr.msk.f32.mxu1 %vm311_vm0, %v295_v6 }
  0xba   : > { %v296_v8 = vpop.trf.xlu1  ;;  %v264_v9 = vpop.trf.xlu0 }
  0xbb   : > { %860 = vmatmul.mubr.msk.f32.vlgmr.msra.gmra.mxu0 %vm311_vm0, %v264_v9  ;;  %884 = vmatmul.mubr.msk.f32.vlgmr.msra.gmra.mxu1 %vm311_vm0, %v296_v8 }
  0xbe   : > { %v297_v10 = vpop.trf.xlu1  ;;  %v265_v11 = vpop.trf.xlu0 }
  0xbf   : > { %862 = vmatprep.mubr.msk.f32.mxu0 %vm311_vm0, %v265_v11  ;;  %886 = vmatprep.mubr.msk.f32.mxu1 %vm311_vm0, %v297_v10 }
  0xc2   : > { %v298_v12 = vpop.trf.xlu1  ;;  %v266_v13 = vpop.trf.xlu0 }
  0xc3   : > { %863 = vmatmul.mubr.msk.f32.gmra.mxu0 %vm311_vm0, %v266_v13  ;;  %887 = vmatmul.mubr.msk.f32.gmra.mxu1 %vm311_vm0, %v298_v12 }
  0xc6   : > { %v299_v14 = vpop.trf.xlu1  ;;  %v267_v15 = vpop.trf.xlu0 }
  0xc7   : > { %865 = vmatprep.mubr.msk.f32.mxu0 %vm311_vm0, %v267_v15  ;;  %889 = vmatprep.mubr.msk.f32.mxu1 %vm311_vm0, %v299_v14 }
  0xca   : > { %v300_v16 = vpop.trf.xlu1  ;;  %v268_v17 = vpop.trf.xlu0 }
  0xcb   : > { %866 = vmatmul.mubr.msk.f32.gmra.mxu0 %vm311_vm0, %v268_v17  ;;  %890 = vmatmul.mubr.msk.f32.gmra.mxu1 %vm311_vm0, %v300_v16 }
  0xce   : > { %v301_v18 = vpop.trf.xlu1  ;;  %v269_v19 = vpop.trf.xlu0 }
  0xcf   : > { %868 = vmatprep.mubr.msk.f32.mxu0 %vm311_vm0, %v269_v19  ;;  %892 = vmatprep.mubr.msk.f32.mxu1 %vm311_vm0, %v301_v18 }
  0xd2   : > { %v302_v20 = vpop.trf.xlu1  ;;  %v270_v21 = vpop.trf.xlu0 }
  0xd3   : > { %869 = vmatmul.mubr.msk.f32.gmra.mxu0 %vm311_vm0, %v270_v21  ;;  %893 = vmatmul.mubr.msk.f32.gmra.mxu1 %vm311_vm0, %v302_v20 }
  0xd6   : > { %v303_v22 = vpop.trf.xlu1  ;;  %v271_v23 = vpop.trf.xlu0 }
  0xd7   : > { %871 = vmatprep.mubr.msk.f32.mxu0 %vm311_vm0, %v271_v23  ;;  %895 = vmatprep.mubr.msk.f32.mxu1 %vm311_vm0, %v303_v22 }
  0xda   : > { %v304_v24 = vpop.trf.xlu1  ;;  %v272_v25 = vpop.trf.xlu0 }
  0xdb   : > { %872 = vmatmul.mubr.msk.f32.gmra.mxu0 %vm311_vm0, %v272_v25  ;;  %896 = vmatmul.mubr.msk.f32.gmra.mxu1 %vm311_vm0, %v304_v24 }
  0xde   : > { %v305_v26 = vpop.trf.xlu1  ;;  %v273_v27 = vpop.trf.xlu0 }
  0xdf   : > { %874 = vmatprep.mubr.msk.f32.mxu0 %vm311_vm0, %v273_v27  ;;  %898 = vmatprep.mubr.msk.f32.mxu1 %vm311_vm0, %v305_v26 }
  0xe2   : > { %v306_v28 = vpop.trf.xlu1  ;;  %v274_v29 = vpop.trf.xlu0 }
  0xe3   : > { %875 = vmatmul.mubr.msk.f32.gmra.mxu0 %vm311_vm0, %v274_v29  ;;  %899 = vmatmul.mubr.msk.f32.gmra.mxu1 %vm311_vm0, %v306_v28 }
  0xe6   : > { %v307_v30 = vpop.trf.xlu1  ;;  %v275_v31 = vpop.trf.xlu0 }
  0xe7   : > { %877 = vmatprep.mubr.msk.f32.mxu0 %vm311_vm0, %v275_v31  ;;  %901 = vmatprep.mubr.msk.f32.mxu1 %vm311_vm0, %v307_v30 }
  0xea   : > { %v308_v32 = vpop.trf.xlu1  ;;  %v276_v33 = vpop.trf.xlu0 }
  0xeb   : > { %878 = vmatmul.mubr.msk.f32.gmra.mxu0 %vm311_vm0, %v276_v33  ;;  %902 = vmatmul.mubr.msk.f32.gmra.mxu1 %vm311_vm0, %v308_v32 }
  0xee   : > { %v309_v34 = vpop.trf.xlu1  ;;  %v277_v35 = vpop.trf.xlu0 }
  0xef   : > { %880 = vmatprep.mubr.msk.f32.mxu0 %vm311_vm0, %v277_v35  ;;  %904 = vmatprep.mubr.msk.f32.mxu1 %vm311_vm0, %v309_v34 }
  0xf2   : > { %v310_v36 = vpop.trf.xlu1  ;;  %v278_v37 = vpop.trf.xlu0 }
  0xf3   : > { %881 = vmatmul.mubr.msk.f32.gmra.mxu0 %vm311_vm0, %v278_v37  ;;  %905 = vmatmul.mubr.msk.f32.gmra.mxu1 %vm311_vm0, %v310_v36 }
 0x17b   : > { %v861_v39 = vpop.f32.mrf.mxu0  ;;  %v885_v40 = vpop.f32.mrf.mxu1 }
 0x17c   : > { %v480_v41 = vadd.f32 %v861_v39, %v1253_v38  ;;  %v560_v42 = vadd.f32 %v885_v40, %v1253_v38 }
 0x17d   : > { %v474_v43 = vpop.f32.mrf.mxu0  ;;  %v554_v44 = vpop.f32.mrf.mxu1 }
 0x17e   : > { %635 = vst.msk [vmem:[%s1258_s12 + $0x8] sm:$0xff] %vm633_vm1, %v480_v41  ;;  %651 = vst.msk [vmem:[%s1258_s12 + $0x88] sm:$0xff] %vm633_vm1, %v560_v42  ;;  %v475_v45 = vadd.f32 %v1253_v38, %v474_v43  ;;  %v555_v46 = vadd.f32 %v1253_v38, %v554_v44 }
 0x180   : > { %634 = vst.msk [vmem:[%s1258_s12] sm:$0xff] %vm633_vm1, %v475_v45  ;;  %650 = vst.msk [vmem:[%s1258_s12 + $0x80] sm:$0xff] %vm633_vm1, %v555_v46 }
 0x183   : > { %v864_v47 = vpop.f32.mrf.mxu0  ;;  %v888_v48 = vpop.f32.mrf.mxu1 }
 0x184   : > { %v490_v49 = vadd.f32 %v864_v47, %v1253_v38  ;;  %v570_v50 = vadd.f32 %v888_v48, %v1253_v38 }
 0x185   : > { %v484_v51 = vpop.f32.mrf.mxu0  ;;  %v564_v52 = vpop.f32.mrf.mxu1 }
 0x186   : > { %637 = vst.msk [vmem:[%s1258_s12 + $0x18] sm:$0xff] %vm633_vm1, %v490_v49  ;;  %653 = vst.msk [vmem:[%s1258_s12 + $0x98] sm:$0xff] %vm633_vm1, %v570_v50  ;;  %v485_v53 = vadd.f32 %v1253_v38, %v484_v51  ;;  %v565_v54 = vadd.f32 %v1253_v38, %v564_v52 }
 0x188   : > { %636 = vst.msk [vmem:[%s1258_s12 + $0x10] sm:$0xff] %vm633_vm1, %v485_v53  ;;  %652 = vst.msk [vmem:[%s1258_s12 + $0x90] sm:$0xff] %vm633_vm1, %v565_v54 }
 0x18b   : > { %v867_v55 = vpop.f32.mrf.mxu0  ;;  %v891_v56 = vpop.f32.mrf.mxu1 }
 0x18c   : > { %v500_v57 = vadd.f32 %v867_v55, %v1253_v38  ;;  %v580_v58 = vadd.f32 %v891_v56, %v1253_v38 }
 0x18d   : > { %v494_v59 = vpop.f32.mrf.mxu0  ;;  %v574_v60 = vpop.f32.mrf.mxu1 }
 0x18e   : > { %639 = vst.msk [vmem:[%s1258_s12 + $0x28] sm:$0xff] %vm633_vm1, %v500_v57  ;;  %655 = vst.msk [vmem:[%s1258_s12 + $0xa8] sm:$0xff] %vm633_vm1, %v580_v58  ;;  %v495_v61 = vadd.f32 %v1253_v38, %v494_v59  ;;  %v575_v62 = vadd.f32 %v1253_v38, %v574_v60 }
 0x190   : > { %638 = vst.msk [vmem:[%s1258_s12 + $0x20] sm:$0xff] %vm633_vm1, %v495_v61  ;;  %654 = vst.msk [vmem:[%s1258_s12 + $0xa0] sm:$0xff] %vm633_vm1, %v575_v62 }
 0x193   : > { %v870_v63 = vpop.f32.mrf.mxu0  ;;  %v894_v0 = vpop.f32.mrf.mxu1 }
 0x194   : > { %v510_v1 = vadd.f32 %v870_v63, %v1253_v38  ;;  %v590_v2 = vadd.f32 %v894_v0, %v1253_v38 }
 0x195   : > { %v504_v3 = vpop.f32.mrf.mxu0  ;;  %v584_v4 = vpop.f32.mrf.mxu1 }
 0x196   : > { %641 = vst.msk [vmem:[%s1258_s12 + $0x38] sm:$0xff] %vm633_vm1, %v510_v1  ;;  %657 = vst.msk [vmem:[%s1258_s12 + $0xb8] sm:$0xff] %vm633_vm1, %v590_v2  ;;  %v505_v5 = vadd.f32 %v1253_v38, %v504_v3  ;;  %v585_v6 = vadd.f32 %v1253_v38, %v584_v4 }
 0x198   : > { %640 = vst.msk [vmem:[%s1258_s12 + $0x30] sm:$0xff] %vm633_vm1, %v505_v5  ;;  %656 = vst.msk [vmem:[%s1258_s12 + $0xb0] sm:$0xff] %vm633_vm1, %v585_v6 }
 0x19b   : > { %v873_v7 = vpop.f32.mrf.mxu0  ;;  %v897_v8 = vpop.f32.mrf.mxu1 }
 0x19c   : > { %v520_v9 = vadd.f32 %v873_v7, %v1253_v38  ;;  %v600_v10 = vadd.f32 %v897_v8, %v1253_v38 }
 0x19d   : > { %v514_v11 = vpop.f32.mrf.mxu0  ;;  %v594_v12 = vpop.f32.mrf.mxu1 }
 0x19e   : > { %643 = vst.msk [vmem:[%s1258_s12 + $0x48] sm:$0xff] %vm633_vm1, %v520_v9  ;;  %659 = vst.msk [vmem:[%s1258_s12 + $0xc8] sm:$0xff] %vm633_vm1, %v600_v10  ;;  %v515_v13 = vadd.f32 %v1253_v38, %v514_v11  ;;  %v595_v14 = vadd.f32 %v1253_v38, %v594_v12 }
 0x1a0   : > { %642 = vst.msk [vmem:[%s1258_s12 + $0x40] sm:$0xff] %vm633_vm1, %v515_v13  ;;  %658 = vst.msk [vmem:[%s1258_s12 + $0xc0] sm:$0xff] %vm633_vm1, %v595_v14 }
 0x1a3   : > { %v876_v15 = vpop.f32.mrf.mxu0  ;;  %v900_v16 = vpop.f32.mrf.mxu1 }
 0x1a4   : > { %v530_v17 = vadd.f32 %v876_v15, %v1253_v38  ;;  %v610_v18 = vadd.f32 %v900_v16, %v1253_v38 }
 0x1a5   : > { %v524_v19 = vpop.f32.mrf.mxu0  ;;  %v604_v20 = vpop.f32.mrf.mxu1 }
 0x1a6   : > { %645 = vst.msk [vmem:[%s1258_s12 + $0x58] sm:$0xff] %vm633_vm1, %v530_v17  ;;  %661 = vst.msk [vmem:[%s1258_s12 + $0xd8] sm:$0xff] %vm633_vm1, %v610_v18  ;;  %v525_v21 = vadd.f32 %v1253_v38, %v524_v19  ;;  %v605_v22 = vadd.f32 %v1253_v38, %v604_v20 }
 0x1a8   : > { %644 = vst.msk [vmem:[%s1258_s12 + $0x50] sm:$0xff] %vm633_vm1, %v525_v21  ;;  %660 = vst.msk [vmem:[%s1258_s12 + $0xd0] sm:$0xff] %vm633_vm1, %v605_v22 }
 0x1ab   : > { %v879_v23 = vpop.f32.mrf.mxu0  ;;  %v903_v24 = vpop.f32.mrf.mxu1 }
 0x1ac   : > { %v540_v25 = vadd.f32 %v879_v23, %v1253_v38  ;;  %v620_v26 = vadd.f32 %v903_v24, %v1253_v38 }
 0x1ad   : > { %v534_v27 = vpop.f32.mrf.mxu0  ;;  %v614_v28 = vpop.f32.mrf.mxu1 }
 0x1ae   : > { %647 = vst.msk [vmem:[%s1258_s12 + $0x68] sm:$0xff] %vm633_vm1, %v540_v25  ;;  %663 = vst.msk [vmem:[%s1258_s12 + $0xe8] sm:$0xff] %vm633_vm1, %v620_v26  ;;  %v535_v29 = vadd.f32 %v1253_v38, %v534_v27  ;;  %v615_v30 = vadd.f32 %v1253_v38, %v614_v28 }
 0x1b0   : > { %646 = vst.msk [vmem:[%s1258_s12 + $0x60] sm:$0xff] %vm633_vm1, %v535_v29  ;;  %662 = vst.msk [vmem:[%s1258_s12 + $0xe0] sm:$0xff] %vm633_vm1, %v615_v30 }
 0x1b3   : > { %v882_v31 = vpop.f32.mrf.mxu0  ;;  %v906_v32 = vpop.f32.mrf.mxu1 }
 0x1b4   : > { %v550_v33 = vadd.f32 %v882_v31, %v1253_v38  ;;  %v630_v34 = vadd.f32 %v906_v32, %v1253_v38 }
 0x1b5   : > { %v544_v35 = vpop.f32.mrf.mxu0  ;;  %v624_v36 = vpop.f32.mrf.mxu1 }
 0x1b6   : > { %649 = vst.msk [vmem:[%s1258_s12 + $0x78] sm:$0xff] %vm633_vm1, %v550_v33  ;;  %665 = vst.msk [vmem:[%s1258_s12 + $0xf8] sm:$0xff] %vm633_vm1, %v630_v34  ;;  %v545_v37 = vadd.f32 %v1253_v38, %v544_v35  ;;  %v625_v39 = vadd.f32 %v1253_v38, %v624_v36 }
 0x1b8   : > { %648 = vst.msk [vmem:[%s1258_s12 + $0x70] sm:$0xff] %vm633_vm1, %v545_v37  ;;  %664 = vst.msk [vmem:[%s1258_s12 + $0xf0] sm:$0xff] %vm633_vm1, %v625_v39 }
 0x1b9 PF: > { %s17_s17 = sadd.s32 1, %s1090_s17   ;;  %s1383_s12 = smov %s1074_s13 }
 0x1ba   : > { %p14_p4 = scmp.ge.s32.totalorder %s17_s17, 4   ;;  %s1384_s13 = smov %s1078_s14 }
 0x1bb   : > { %s1385_s14 = smov %s1192_s9  ;;  %s1386_s15 = smov %s1086_s16 }
 0x1bc   : > { %s1387_s16 = smov %s1389_s25  ;;  %16 = sbr.rel (!%p14_p4) target bundleno = 5 (0x5), region = 76 }
 0x1c1   :  { %696 = vsyncpa [#allocation3], 1 }
 0x1c2   :  { %698 = vsyncpa [#allocation3 + $0x1], 1 }
 0x1c3   :  { %699 = vsyncpa [#allocation5], 1 }

// kernel: tpu_custom_call.1
= control target key start
LH: loop header
LB: loop body
LE: loop exit
PB: predicated region body
PF: predicated region fallthrough
CT: control target
= control target key end

     0   :  { %8 = vsyncpa [#allocation3], 0  ;;  %s1374_s0 = inlined_call_operand.hbm [shape: f32[2,16,256], index: 0, kind: input, shape index: {}]   ;;  %s1375_s1 = inlined_call_operand.hbm [shape: f32[16,32], index: 1, kind: input, shape index: {}]   ;;  %s1376_s2 = inlined_call_operand.vmem [shape: f32[1,32], index: 2, kind: input, shape index: {}]   ;;  %s1377_s3 = inlined_call_operand.vmem [shape: f32[2,256,32], index: 3, kind: output, shape index: {}]  }
   0x1   :  { %10 = vsyncpa [#allocation3 + $0x1], 0 }
   0x2   :  { %11 = vsyncpa [#allocation5], 0  ;;  %s1118_s12 = smov 0   ;;  %s1120_s13 = smov 0  }
   0x3   :  { %s1122_s14 = smov 0   ;;  %s1124_s15 = smov 0  }
   0x4   :  { %s1126_s16 = smov 0   ;;  %s1128_s17 = smov 0  }
   0x5 LB: > { %s771_s18 = sadd.s32 4294967295, %s1090_s17   ;;  %p51_p0 = scmp.ne.s32.totalorder %s1074_s13, %s1070_s12  ;;  %s1090_s17 = sphi %s1128_s17, %s17_s17   ;;  %s1086_s16 = sphi %s1126_s16, %s1387_s16   ;;  %s1082_s15 = sphi %s1124_s15, %s1386_s15   ;;  %s1078_s14 = sphi %s1122_s14, %s1385_s14   ;;  %s1074_s13 = sphi %s1120_s13, %s1384_s13   ;;  %s1070_s12 = sphi %s1118_s12, %s1383_s12  }
   0x6   : > { %p1148_p1 = scmp.eq.s32.totalorder %s771_s18, 0  ;;  %p773_p2 = scmp.ge.s32.totalorder %s1090_s17, 1 }
   0x7   : > { %p132_p3 = scmp.lt.s32.totalorder %s1090_s17, 3  ;;  %s1092_s22 = smov [#allocation4]  }
   0x8   : > { %p1156_p4 = por %p1148_p1, %p51_p0  ;;  %s144_s23 = sshll.u32 %s1092_s22, 4  ;;  %s145_s23 = int_to_ptr.vmem [resolvable:$true] %s144_s23 }
   0x9   : > { %p1160_p5 = pnand %p773_p2, %p132_p3  ;;  %s29_s25 = sadd.s32 1, %s1086_s16 }
   0xa   : > { %s993_s26 = scalar_lea.vmem %s145_s23, 256  ;;  %p1001_p12 = scmp.lt.s32.totalorder %s145_s23, %s145_s23 }
   0xb   : > { %p917_p6 = pneg %p1160_p5  ;;  %p994_p9 = scmp.ne.s32.totalorder %s145_s23, %s993_s26 }
   0xc   : > { %p1002_p13 = scmp.lt.s32.totalorder %s993_s26, %s993_s26 }
   0xd   : > { %p1168_p7 = pnand %p917_p6, %p1148_p1 }
   0xe   : > { %p1003_p0 = por %p1002_p13, %p1001_p12 }
   0xf   : > { %p984_p8 = pneg %p1168_p7 }
  0x11   : > { %p996_p10 = pnand %p994_p9, %p984_p8 }
  0x13   : > { %p997_p11 = pneg %p996_p10 }
  0x15   : > { %p1004_p2 = pnand %p1003_p0, %p997_p11 }
  0x17   : > { %1007 = shalt.err (!%p1004_p2)
}
  0x18   : > { %s1093_s27 = smov 128   ;;  %s1094_s28 = smov 8  }
  0x19   : > { %920 = dma.hbm_to_vmem [thread:$0]  (!%p1168_p7), %s1375_s1, 256, %s145_s23, [#allocation5], %s1093_s27, %s1093_s27, %s1094_s28  }
  0x1a   : > { %p31_p3 = scmp.ge.s32.totalorder %s29_s25, 2  ;;  %s38_s4 = sadd.s32 1, %s1078_s14 }
  0x1b   : > { %p45_p6 = scmp.ne.s32.totalorder %s1078_s14, %s1074_s13  ;;  %p46_p8 = scmp.eq.s32.totalorder %s1090_s17, 0 }
  0x1c   : > { %s1389_s25 = smov (%p31_p3, %s29_s25), 0  ;;  %p926_p10 = scmp.lt.s32.totalorder %s1090_s17, 2 }
  0x1d   : > { %p47_p9 = por %p46_p8, %p45_p6  ;;  %s33_s5 = ssub.s32 %s1086_s16, %s1389_s25 }
  0x1e   : > { %s161_s6 = sand.u32 1, %s1078_s14   ;;  %p36_p11 = scmp.eq.s32.totalorder %s33_s5, 0 }
  0x1f   : > { %s776_s7 = sshll.u32 %s161_s6, 5  ;;  %s819_s8 = sshll.u32 %s1086_s16, 9 }
  0x20   : > { %s1192_s9 = scalar_select %p36_p11, %s1078_s14, %s38_s4  }
  0x21   : > { %s173_s12 = scalar_lea.hbm %s1374_s0, %s819_s8  ;;  %s165_s18 = scalar_lea.vmem [#allocation2], %s776_s7 }
  0x22   : > { %s174_s22 = sshll.u32 %s165_s18, 4  ;;  %p1197_p7 = pnand %p926_p10, %p47_p9  ;;  %s175_s22 = int_to_ptr.vmem [resolvable:$true] %s174_s22 }
  0x23   : > { %s162_s24 = scalar_lea.sflag [#allocation3], %s161_s6  ;;  %s1021_s26 = scalar_lea.vmem %s175_s22, 512 }
  0x24   : > { %p1010_p12 = pneg %p1197_p7  ;;  %p1022_p13 = scmp.ne.s32.totalorder %s175_s22, %s1021_s26 }
  0x25   : > { %s1095_s27 = smov [#allocation2]  }
  0x26   : > { %p1024_p0 = pnand %p1022_p13, %p1010_p12  ;;  %s1026_s28 = sshll.u32 %s1095_s27, 4  ;;  %s1027_s28 = int_to_ptr.vmem [resolvable:$false] %s1026_s28 }
  0x27   : > { %s1028_s29 = scalar_lea.vmem %s1027_s28, 1024  ;;  %p1029_p3 = scmp.lt.s32.totalorder %s175_s22, %s1027_s28 }
  0x28   : > { %p1025_p2 = pneg %p1024_p0  ;;  %p1030_p6 = scmp.lt.s32.totalorder %s1028_s29, %s1021_s26 }
  0x2a   : > { %p1031_p8 = por %p1030_p6, %p1029_p3 }
  0x2c   : > { %p1032_p9 = pnand %p1031_p8, %p1025_p2 }
  0x2e   : > { %1035 = shalt.err (!%p1032_p9)
}
  0x2f   : > { %s1096_s30 = smov 256   ;;  %s1097_s4 = smov 16  }
  0x30   : > { %924 = dma.hbm_to_vmem [thread:$0]  (!%p1197_p7), %s173_s12, 512, %s175_s22, %s162_s24, %s1096_s30, %s1096_s30, %s1097_s4  }
  0x31   : > { %186 = sbr.rel (%p1160_p5) target bundleno = 441 (0x1b9), region = 32  ;;  %s188_s5 = sand.u32 (!%p1160_p5), 1, %s1074_s13  }
  0x32   : > { %s780_s6 = sshll.u32 (!%p1160_p5), %s188_s5, 5  ;;  %s189_s7 = scalar_lea.sflag (!%p1160_p5), [#allocation3], %s188_s5 }
  0x33   : > { %s192_s8 = scalar_lea.vmem (!%p1160_p5), [#allocation2], %s780_s6 }
  0x36   : > { %1061 = dma.done.wait (%p1156_p4), %s189_s7, 512  }
  0x37   : > { %1063 = vsyncadd (%p1156_p4), %s189_s7, 4294966784 }
  0x38   : > { %1065 = dma.done.wait (%p1148_p1), [#allocation5], 256  }
  0x39   : > { %1067 = vsyncadd (%p1148_p1), [#allocation5], 4294967040  ;;  %v235_v0 = vld [vmem:[%s192_s8 + $0x8] sm:$0xff]  ;;  %v234_v1 = vld [vmem:[%s192_s8] sm:$0xff]  ;;  %vm311_vm0 = vcmask 130048   ;;  %p225_p1 = scmp.lt.s32.totalorder %s1082_s15, 1 }
  0x3a   : > { %279 = vxpose.xlu1.b32.start [1/2] (short) %v235_v0, 128  ;;  %247 = vxpose.xlu0.b32.start [1/2] (short) %v234_v1, 128  ;;  %v239_v2 = vld [vmem:[#allocation4 + $0x8] sm:$0xff]  ;;  %v238_v3 = vld [vmem:[#allocation4] sm:$0xff]  ;;  %v237_v4 = vld [vmem:[%s192_s8 + $0x18] sm:$0xff]  ;;  %vm633_vm1 = vcmask 261120  }
  0x3b   : > { %v236_v5 = vld [vmem:[%s192_s8 + $0x10] sm:$0xff]  ;;  %855 = vmatprep.subr.mxu0 %v239_v2  ;;  %907 = vmatprep.subr.mxu1 %v239_v2  ;;  %s1391_s15 = smov (!%p225_p1, %s1082_s15), 1  ;;  %v1253_v38 = vld [vmem:[%s1376_s2] ss:$0 sm:$0xff] }
  0x3c   : > { %856 = vmatpush3.msra.mxu0 %v239_v2  ;;  %909 = vmatpush3.msra.mxu1 %v239_v2  ;;  %s820_s19 = sshll.u32 %s1391_s15, 8 }
  0x3d   : > { %857 = vmatprep.subr.mxu0 %v238_v3  ;;  %908 = vmatprep.subr.mxu1 %v238_v3  ;;  %s1258_s12 = scalar_lea.vmem %s1377_s3, %s820_s19 }
  0x3e   : > { %280 = vxpose.xlu1.b32.end [2/2] (short) %v237_v4, 128  ;;  %248 = vxpose.xlu0.b32.end [2/2] (short) %v236_v5, 128 }
  0x3f   : > { %858 = vmatpush3.msra.mxu0 %v238_v3  ;;  %910 = vmatpush3.msra.mxu1 %v238_v3 }
  0xb6   : > { %v295_v6 = vpop.trf.xlu1  ;;  %v263_v7 = vpop.trf.xlu0 }
  0xb7   : > { %859 = vmatprep.mubr.msk.f32.mxu0 %vm311_vm0, %v263_v7  ;;  %883 = vmatprep.mubr.msk.f32.mxu1 %vm311_vm0, %v295_v6 }
  0xba   : > { %v296_v8 = vpop.trf.xlu1  ;;  %v264_v9 = vpop.trf.xlu0 }
  0xbb   : > { %860 = vmatmul.mubr.msk.f32.vlgmr.msra.gmra.mxu0 %vm311_vm0, %v264_v9  ;;  %884 = vmatmul.mubr.msk.f32.vlgmr.msra.gmra.mxu1 %vm311_vm0, %v296_v8 }
  0xbe   : > { %v297_v10 = vpop.trf.xlu1  ;;  %v265_v11 = vpop.trf.xlu0 }
  0xbf   : > { %862 = vmatprep.mubr.msk.f32.mxu0 %vm311_vm0, %v265_v11  ;;  %886 = vmatprep.mubr.msk.f32.mxu1 %vm311_vm0, %v297_v10 }
  0xc2   : > { %v298_v12 = vpop.trf.xlu1  ;;  %v266_v13 = vpop.trf.xlu0 }
  0xc3   : > { %863 = vmatmul.mubr.msk.f32.gmra.mxu0 %vm311_vm0, %v266_v13  ;;  %887 = vmatmul.mubr.msk.f32.gmra.mxu1 %vm311_vm0, %v298_v12 }
  0xc6   : > { %v299_v14 = vpop.trf.xlu1  ;;  %v267_v15 = vpop.trf.xlu0 }
  0xc7   : > { %865 = vmatprep.mubr.msk.f32.mxu0 %vm311_vm0, %v267_v15  ;;  %889 = vmatprep.mubr.msk.f32.mxu1 %vm311_vm0, %v299_v14 }
  0xca   : > { %v300_v16 = vpop.trf.xlu1  ;;  %v268_v17 = vpop.trf.xlu0 }
  0xcb   : > { %866 = vmatmul.mubr.msk.f32.gmra.mxu0 %vm311_vm0, %v268_v17  ;;  %890 = vmatmul.mubr.msk.f32.gmra.mxu1 %vm311_vm0, %v300_v16 }
  0xce   : > { %v301_v18 = vpop.trf.xlu1  ;;  %v269_v19 = vpop.trf.xlu0 }
  0xcf   : > { %868 = vmatprep.mubr.msk.f32.mxu0 %vm311_vm0, %v269_v19  ;;  %892 = vmatprep.mubr.msk.f32.mxu1 %vm311_vm0, %v301_v18 }
  0xd2   : > { %v302_v20 = vpop.trf.xlu1  ;;  %v270_v21 = vpop.trf.xlu0 }
  0xd3   : > { %869 = vmatmul.mubr.msk.f32.gmra.mxu0 %vm311_vm0, %v270_v21  ;;  %893 = vmatmul.mubr.msk.f32.gmra.mxu1 %vm311_vm0, %v302_v20 }
  0xd6   : > { %v303_v22 = vpop.trf.xlu1  ;;  %v271_v23 = vpop.trf.xlu0 }
  0xd7   : > { %871 = vmatprep.mubr.msk.f32.mxu0 %vm311_vm0, %v271_v23  ;;  %895 = vmatprep.mubr.msk.f32.mxu1 %vm311_vm0, %v303_v22 }
  0xda   : > { %v304_v24 = vpop.trf.xlu1  ;;  %v272_v25 = vpop.trf.xlu0 }
  0xdb   : > { %872 = vmatmul.mubr.msk.f32.gmra.mxu0 %vm311_vm0, %v272_v25  ;;  %896 = vmatmul.mubr.msk.f32.gmra.mxu1 %vm311_vm0, %v304_v24 }
  0xde   : > { %v305_v26 = vpop.trf.xlu1  ;;  %v273_v27 = vpop.trf.xlu0 }
  0xdf   : > { %874 = vmatprep.mubr.msk.f32.mxu0 %vm311_vm0, %v273_v27  ;;  %898 = vmatprep.mubr.msk.f32.mxu1 %vm311_vm0, %v305_v26 }
  0xe2   : > { %v306_v28 = vpop.trf.xlu1  ;;  %v274_v29 = vpop.trf.xlu0 }
  0xe3   : > { %875 = vmatmul.mubr.msk.f32.gmra.mxu0 %vm311_vm0, %v274_v29  ;;  %899 = vmatmul.mubr.msk.f32.gmra.mxu1 %vm311_vm0, %v306_v28 }
  0xe6   : > { %v307_v30 = vpop.trf.xlu1  ;;  %v275_v31 = vpop.trf.xlu0 }
  0xe7   : > { %877 = vmatprep.mubr.msk.f32.mxu0 %vm311_vm0, %v275_v31  ;;  %901 = vmatprep.mubr.msk.f32.mxu1 %vm311_vm0, %v307_v30 }
  0xea   : > { %v308_v32 = vpop.trf.xlu1  ;;  %v276_v33 = vpop.trf.xlu0 }
  0xeb   : > { %878 = vmatmul.mubr.msk.f32.gmra.mxu0 %vm311_vm0, %v276_v33  ;;  %902 = vmatmul.mubr.msk.f32.gmra.mxu1 %vm311_vm0, %v308_v32 }
  0xee   : > { %v309_v34 = vpop.trf.xlu1  ;;  %v277_v35 = vpop.trf.xlu0 }
  0xef   : > { %880 = vmatprep.mubr.msk.f32.mxu0 %vm311_vm0, %v277_v35  ;;  %904 = vmatprep.mubr.msk.f32.mxu1 %vm311_vm0, %v309_v34 }
  0xf2   : > { %v310_v36 = vpop.trf.xlu1  ;;  %v278_v37 = vpop.trf.xlu0 }
  0xf3   : > { %881 = vmatmul.mubr.msk.f32.gmra.mxu0 %vm311_vm0, %v278_v37  ;;  %905 = vmatmul.mubr.msk.f32.gmra.mxu1 %vm311_vm0, %v310_v36 }
 0x17b   : > { %v861_v39 = vpop.f32.mrf.mxu0  ;;  %v885_v40 = vpop.f32.mrf.mxu1 }
 0x17c   : > { %v480_v41 = vadd.f32 %v861_v39, %v1253_v38  ;;  %v560_v42 = vadd.f32 %v885_v40, %v1253_v38 }
 0x17d   : > { %v474_v43 = vpop.f32.mrf.mxu0  ;;  %v554_v44 = vpop.f32.mrf.mxu1 }
 0x17e   : > { %635 = vst.msk [vmem:[%s1258_s12 + $0x8] sm:$0xff] %vm633_vm1, %v480_v41  ;;  %651 = vst.msk [vmem:[%s1258_s12 + $0x88] sm:$0xff] %vm633_vm1, %v560_v42  ;;  %v475_v45 = vadd.f32 %v1253_v38, %v474_v43  ;;  %v555_v46 = vadd.f32 %v1253_v38, %v554_v44 }
 0x180   : > { %634 = vst.msk [vmem:[%s1258_s12] sm:$0xff] %vm633_vm1, %v475_v45  ;;  %650 = vst.msk [vmem:[%s1258_s12 + $0x80] sm:$0xff] %vm633_vm1, %v555_v46 }
 0x183   : > { %v864_v47 = vpop.f32.mrf.mxu0  ;;  %v888_v48 = vpop.f32.mrf.mxu1 }
 0x184   : > { %v490_v49 = vadd.f32 %v864_v47, %v1253_v38  ;;  %v570_v50 = vadd.f32 %v888_v48, %v1253_v38 }
 0x185   : > { %v484_v51 = vpop.f32.mrf.mxu0  ;;  %v564_v52 = vpop.f32.mrf.mxu1 }
 0x186   : > { %637 = vst.msk [vmem:[%s1258_s12 + $0x18] sm:$0xff] %vm633_vm1, %v490_v49  ;;  %653 = vst.msk [vmem:[%s1258_s12 + $0x98] sm:$0xff] %vm633_vm1, %v570_v50  ;;  %v485_v53 = vadd.f32 %v1253_v38, %v484_v51  ;;  %v565_v54 = vadd.f32 %v1253_v38, %v564_v52 }
 0x188   : > { %636 = vst.msk [vmem:[%s1258_s12 + $0x10] sm:$0xff] %vm633_vm1, %v485_v53  ;;  %652 = vst.msk [vmem:[%s1258_s12 + $0x90] sm:$0xff] %vm633_vm1, %v565_v54 }
 0x18b   : > { %v867_v55 = vpop.f32.mrf.mxu0  ;;  %v891_v56 = vpop.f32.mrf.mxu1 }
 0x18c   : > { %v500_v57 = vadd.f32 %v867_v55, %v1253_v38  ;;  %v580_v58 = vadd.f32 %v891_v56, %v1253_v38 }
 0x18d   : > { %v494_v59 = vpop.f32.mrf.mxu0  ;;  %v574_v60 = vpop.f32.mrf.mxu1 }
 0x18e   : > { %639 = vst.msk [vmem:[%s1258_s12 + $0x28] sm:$0xff] %vm633_vm1, %v500_v57  ;;  %655 = vst.msk [vmem:[%s1258_s12 + $0xa8] sm:$0xff] %vm633_vm1, %v580_v58  ;;  %v495_v61 = vadd.f32 %v1253_v38, %v494_v59  ;;  %v575_v62 = vadd.f32 %v1253_v38, %v574_v60 }
 0x190   : > { %638 = vst.msk [vmem:[%s1258_s12 + $0x20] sm:$0xff] %vm633_vm1, %v495_v61  ;;  %654 = vst.msk [vmem:[%s1258_s12 + $0xa0] sm:$0xff] %vm633_vm1, %v575_v62 }
 0x193   : > { %v870_v63 = vpop.f32.mrf.mxu0  ;;  %v894_v0 = vpop.f32.mrf.mxu1 }
 0x194   : > { %v510_v1 = vadd.f32 %v870_v63, %v1253_v38  ;;  %v590_v2 = vadd.f32 %v894_v0, %v1253_v38 }
 0x195   : > { %v504_v3 = vpop.f32.mrf.mxu0  ;;  %v584_v4 = vpop.f32.mrf.mxu1 }
 0x196   : > { %641 = vst.msk [vmem:[%s1258_s12 + $0x38] sm:$0xff] %vm633_vm1, %v510_v1  ;;  %657 = vst.msk [vmem:[%s1258_s12 + $0xb8] sm:$0xff] %vm633_vm1, %v590_v2  ;;  %v505_v5 = vadd.f32 %v1253_v38, %v504_v3  ;;  %v585_v6 = vadd.f32 %v1253_v38, %v584_v4 }
 0x198   : > { %640 = vst.msk [vmem:[%s1258_s12 + $0x30] sm:$0xff] %vm633_vm1, %v505_v5  ;;  %656 = vst.msk [vmem:[%s1258_s12 + $0xb0] sm:$0xff] %vm633_vm1, %v585_v6 }
 0x19b   : > { %v873_v7 = vpop.f32.mrf.mxu0  ;;  %v897_v8 = vpop.f32.mrf.mxu1 }
 0x19c   : > { %v520_v9 = vadd.f32 %v873_v7, %v1253_v38  ;;  %v600_v10 = vadd.f32 %v897_v8, %v1253_v38 }
 0x19d   : > { %v514_v11 = vpop.f32.mrf.mxu0  ;;  %v594_v12 = vpop.f32.mrf.mxu1 }
 0x19e   : > { %643 = vst.msk [vmem:[%s1258_s12 + $0x48] sm:$0xff] %vm633_vm1, %v520_v9  ;;  %659 = vst.msk [vmem:[%s1258_s12 + $0xc8] sm:$0xff] %vm633_vm1, %v600_v10  ;;  %v515_v13 = vadd.f32 %v1253_v38, %v514_v11  ;;  %v595_v14 = vadd.f32 %v1253_v38, %v594_v12 }
 0x1a0   : > { %642 = vst.msk [vmem:[%s1258_s12 + $0x40] sm:$0xff] %vm633_vm1, %v515_v13  ;;  %658 = vst.msk [vmem:[%s1258_s12 + $0xc0] sm:$0xff] %vm633_vm1, %v595_v14 }
 0x1a3   : > { %v876_v15 = vpop.f32.mrf.mxu0  ;;  %v900_v16 = vpop.f32.mrf.mxu1 }
 0x1a4   : > { %v530_v17 = vadd.f32 %v876_v15, %v1253_v38  ;;  %v610_v18 = vadd.f32 %v900_v16, %v1253_v38 }
 0x1a5   : > { %v524_v19 = vpop.f32.mrf.mxu0  ;;  %v604_v20 = vpop.f32.mrf.mxu1 }
 0x1a6   : > { %645 = vst.msk [vmem:[%s1258_s12 + $0x58] sm:$0xff] %vm633_vm1, %v530_v17  ;;  %661 = vst.msk [vmem:[%s1258_s12 + $0xd8] sm:$0xff] %vm633_vm1, %v610_v18  ;;  %v525_v21 = vadd.f32 %v1253_v38, %v524_v19  ;;  %v605_v22 = vadd.f32 %v1253_v38, %v604_v20 }
 0x1a8   : > { %644 = vst.msk [vmem:[%s1258_s12 + $0x50] sm:$0xff] %vm633_vm1, %v525_v21  ;;  %660 = vst.msk [vmem:[%s1258_s12 + $0xd0] sm:$0xff] %vm633_vm1, %v605_v22 }
 0x1ab   : > { %v879_v23 = vpop.f32.mrf.mxu0  ;;  %v903_v24 = vpop.f32.mrf.mxu1 }
 0x1ac   : > { %v540_v25 = vadd.f32 %v879_v23, %v1253_v38  ;;  %v620_v26 = vadd.f32 %v903_v24, %v1253_v38 }
 0x1ad   : > { %v534_v27 = vpop.f32.mrf.mxu0  ;;  %v614_v28 = vpop.f32.mrf.mxu1 }
 0x1ae   : > { %647 = vst.msk [vmem:[%s1258_s12 + $0x68] sm:$0xff] %vm633_vm1, %v540_v25  ;;  %663 = vst.msk [vmem:[%s1258_s12 + $0xe8] sm:$0xff] %vm633_vm1, %v620_v26  ;;  %v535_v29 = vadd.f32 %v1253_v38, %v534_v27  ;;  %v615_v30 = vadd.f32 %v1253_v38, %v614_v28 }
 0x1b0   : > { %646 = vst.msk [vmem:[%s1258_s12 + $0x60] sm:$0xff] %vm633_vm1, %v535_v29  ;;  %662 = vst.msk [vmem:[%s1258_s12 + $0xe0] sm:$0xff] %vm633_vm1, %v615_v30 }
 0x1b3   : > { %v882_v31 = vpop.f32.mrf.mxu0  ;;  %v906_v32 = vpop.f32.mrf.mxu1 }
 0x1b4   : > { %v550_v33 = vadd.f32 %v882_v31, %v1253_v38  ;;  %v630_v34 = vadd.f32 %v906_v32, %v1253_v38 }
 0x1b5   : > { %v544_v35 = vpop.f32.mrf.mxu0  ;;  %v624_v36 = vpop.f32.mrf.mxu1 }
 0x1b6   : > { %649 = vst.msk [vmem:[%s1258_s12 + $0x78] sm:$0xff] %vm633_vm1, %v550_v33  ;;  %665 = vst.msk [vmem:[%s1258_s12 + $0xf8] sm:$0xff] %vm633_vm1, %v630_v34  ;;  %v545_v37 = vadd.f32 %v1253_v38, %v544_v35  ;;  %v625_v39 = vadd.f32 %v1253_v38, %v624_v36 }
 0x1b8   : > { %648 = vst.msk [vmem:[%s1258_s12 + $0x70] sm:$0xff] %vm633_vm1, %v545_v37  ;;  %664 = vst.msk [vmem:[%s1258_s12 + $0xf0] sm:$0xff] %vm633_vm1, %v625_v39 }
 0x1b9 PF: > { %s17_s17 = sadd.s32 1, %s1090_s17   ;;  %s1383_s12 = smov %s1074_s13 }
 0x1ba   : > { %p14_p4 = scmp.ge.s32.totalorder %s17_s17, 4   ;;  %s1384_s13 = smov %s1078_s14 }
 0x1bb   : > { %s1385_s14 = smov %s1192_s9  ;;  %s1386_s15 = smov %s1086_s16 }
 0x1bc   : > { %s1387_s16 = smov %s1389_s25  ;;  %16 = sbr.rel (!%p14_p4) target bundleno = 5 (0x5), region = 76 }
 0x1c1   :  { %696 = vsyncpa [#allocation3], 1 }
 0x1c2   :  { %698 = vsyncpa [#allocation3 + $0x1], 1 }
 0x1c3   :  { %699 = vsyncpa [#allocation5], 1 }

</bundles_post_ra>
